<compile_context>
chip_gen: v6e
topology: v6e:2x2x1
jax: 0.10.0
libtpu: 0.0.40
codegen_flags: <defaults>
</compile_context>

<pallas_src>
import functools

import jax
import jax.numpy as jnp
from jax import lax
from jax.experimental import pallas as pl
from jax.experimental.pallas import tpu as pltpu

# ----------------------------- config (small synthetic) -----------------------------
VOCAB = 100
MAX_POS = 16
H = 32            # bert hidden size
NH = 2            # attention heads
DH = H // NH      # head dim
FFN = 64          # bert intermediate size
N_BERT_LAYERS = 2
NUM_FEAT = 4      # numerical features per timestep (matches LSTM input_size = H + 4)
LSTM_H = 32       # lstm_hidden_size (paper default 128; small here)
NUM_LSTM_LAYERS = 3

VMEM_SPEC = pl.BlockSpec(memory_space=pltpu.MemorySpace.VMEM)


# ----------------------------- in-kernel helpers -----------------------------

def _ln(x, g, b, eps=1e-12):
    mu = jnp.mean(x, axis=-1, keepdims=True)
    var = jnp.mean((x - mu) ** 2, axis=-1, keepdims=True)
    return (x - mu) * lax.rsqrt(var + eps) * g + b


# ----------------------------- kernel 1: embedding add + LayerNorm -----------------------------

def _embed_ln_kernel(we_ref, pe_ref, g_ref, b_ref, o_ref):
    # fold word_emb + pos_emb add into the LN kernel (no HBM round trip of the sum)
    x = we_ref[...].astype(jnp.float32) + pe_ref[...]          # (B,S,H) + (1,S,H)
    o_ref[...] = _ln(x, g_ref[...], b_ref[...]).astype(o_ref.dtype)


def embed_layernorm(word_emb, pos_emb, gamma, beta):
    B, S, Hd = word_emb.shape
    return pl.pallas_call(
        _embed_ln_kernel,
        out_shape=jax.ShapeDtypeStruct((B, S, Hd), jnp.float32),
        in_specs=[VMEM_SPEC] * 4,
        out_specs=VMEM_SPEC,
    )(word_emb, pos_emb, gamma.reshape(1, 1, Hd), beta.reshape(1, 1, Hd))


# ----------------------------- kernel 2: fused BERT encoder layer -----------------------------

def _bert_layer_kernel(h_ref, bias_ref, wqkv_ref, bqkv_ref, wo_ref, bo_ref,
                       ln1g_ref, ln1b_ref, w1_ref, b1_ref, w2_ref, b2_ref,
                       ln2g_ref, ln2b_ref, o_ref, *, nh, scale):
    B, S, Hd = h_ref.shape
    dh = Hd // nh

    x = h_ref[...].astype(jnp.float32)                         # (B,S,H)
    x2 = x.reshape(B * S, Hd)

    # fused QKV projection: one (B*S, H) @ (H, 3H) matmul
    qkv = jnp.dot(x2, wqkv_ref[...], preferred_element_type=jnp.float32) + bqkv_ref[...]
    q = qkv[:, 0 * Hd:1 * Hd].reshape(B, S, Hd)
    k = qkv[:, 1 * Hd:2 * Hd].reshape(B, S, Hd)
    v = qkv[:, 2 * Hd:3 * Hd].reshape(B, S, Hd)
    bias = bias_ref[...]                                       # (B,1,S) additive mask

    # all heads in one kernel invocation; per-head context is folded directly into the
    # output projection (ctx_h @ wo[rows_h]) so no concat / transpose is needed.
    attn = jnp.zeros((B * S, Hd), jnp.float32)
    for head in range(nh):
        sl = slice(head * dh, (head + 1) * dh)
        qh, kh, vh = q[:, :, sl], k[:, :, sl], v[:, :, sl]
        s = jnp.einsum('bqd,bkd->bqk', qh, kh,
                       preferred_element_type=jnp.float32) * scale + bias   # (B,S,S)
        s = s - jnp.max(s, axis=-1, keepdims=True)
        p = jnp.exp(s)
        p = p * pl.reciprocal(jnp.sum(p, axis=-1, keepdims=True), approx=True)
        ctx = jnp.einsum('bqk,bkd->bqd', p, vh,
                         preferred_element_type=jnp.float32)                # (B,S,dh)
        attn = attn + jnp.dot(ctx.reshape(B * S, dh), wo_ref[sl, :],
                              preferred_element_type=jnp.float32)
    attn = attn + bo_ref[...]

    hn = _ln(x2 + attn, ln1g_ref[...], ln1b_ref[...])
    ffn = jax.nn.gelu(jnp.dot(hn, w1_ref[...], preferred_element_type=jnp.float32)
                      + b1_ref[...])
    ffn = jnp.dot(ffn, w2_ref[...], preferred_element_type=jnp.float32) + b2_ref[...]
    out = _ln(hn + ffn, ln2g_ref[...], ln2b_ref[...])
    o_ref[...] = out.reshape(B, S, Hd).astype(o_ref.dtype)


def bert_layer(h, bias, lp):
    B, S, Hd = h.shape
    kernel = functools.partial(_bert_layer_kernel, nh=NH, scale=1.0 / (DH ** 0.5))
    return pl.pallas_call(
        kernel,
        out_shape=jax.ShapeDtypeStruct((B, S, Hd), jnp.float32),
        in_specs=[VMEM_SPEC] * 14,
        out_specs=VMEM_SPEC,
    )(h, bias,
      lp["wqkv"], lp["bqkv"].reshape(1, 3 * Hd),
      lp["wo"], lp["bo"].reshape(1, Hd),
      lp["ln1_g"].reshape(1, Hd), lp["ln1_b"].reshape(1, Hd),
      lp["w1"], lp["b1"].reshape(1, FFN),
      lp["w2"], lp["b2"].reshape(1, Hd),
      lp["ln2_g"].reshape(1, Hd), lp["ln2_b"].reshape(1, Hd))


# ----------------------------- kernel 3: fused 3-layer LSTM + fc1/relu + fc2 -----------------------------

def _lstm_fc_kernel(x_ref,
                    wih0_ref, whh0_ref, b0_ref,
                    wih1_ref, whh1_ref, b1_ref,
                    wih2_ref, whh2_ref, b2_ref,
                    fc1w_ref, fc1b_ref, fc2w_ref, fc2b_ref,
                    o_ref, act_scr):
    # x_ref: (S, B, H+4) time-major; act_scr: (S, B, LSTM_H) inter-layer VMEM buffer.
    S, B, _ = x_ref.shape
    Hd = whh0_ref.shape[-1]

    def run_layer(read_x, write_h, wih_ref, whh_ref, b_ref):
        # hoist all weight / bias loads out of the time loop (loop-invariant);
        # per-gate pre-split weights -> no lane-offset gate slicing on the recurrence.
        wx = [wih_ref[g] for g in range(4)]     # each (In, Hd)
        wh = [whh_ref[g] for g in range(4)]     # each (Hd, Hd)
        bb = [b_ref[g] for g in range(4)]       # each (1, Hd)
        h = jnp.zeros((B, Hd), jnp.float32)
        c = jnp.zeros((B, Hd), jnp.float32)
        # S is tiny and static: a Python loop = maximal unroll with static time indices,
        # giving the scheduler full visibility across timesteps.
        for t in range(S):
            x_t = read_x(t)                                             # (B, In)
            pre = [jnp.dot(x_t, wx[g], preferred_element_type=jnp.float32)
                   + jnp.dot(h, wh[g], preferred_element_type=jnp.float32)
                   + bb[g] for g in range(4)]
            i = jax.nn.sigmoid(pre[0])          # PyTorch gate order: i, f, g, o
            f = jax.nn.sigmoid(pre[1])
            g_ = jnp.tanh(pre[2])
            o = jax.nn.sigmoid(pre[3])
            c = f * c + i * g_
            h = o * jnp.tanh(c)
            write_h(t, h)
        return h

    def write_act(t, h):
        act_scr[t] = h

    # layer 0: external input, writes inter-layer activation to VMEM scratch
    run_layer(lambda t: x_ref[t], write_act, wih0_ref, whh0_ref, b0_ref)
    # layer 1: reads + overwrites scratch in place (read at t precedes write at t)
    run_layer(lambda t: act_scr[t], write_act, wih1_ref, whh1_ref, b1_ref)
    # layer 2: downstream only needs the final hidden state -> no per-step stores
    h_last = run_layer(lambda t: act_scr[t], lambda t, h: None,
                       wih2_ref, whh2_ref, b2_ref)

    # fused fc1 -> relu -> fc2 head (dropout = identity in eval mode)
    z = jnp.maximum(jnp.dot(h_last, fc1w_ref[...], preferred_element_type=jnp.float32)
                    + fc1b_ref[...], 0.0)
    out = jnp.dot(z, fc2w_ref[...], preferred_element_type=jnp.float32) + fc2b_ref[...]
    o_ref[...] = out.astype(o_ref.dtype)


def lstm_fc_head(x_sbf, lstm_layers, fc1_w, fc1_b, fc2_w, fc2_b):
    S, B, _ = x_sbf.shape
    args = [x_sbf]
    for lp in lstm_layers:
        args += [lp["w_ih"], lp["w_hh"], lp["b"]]
    args += [fc1_w, fc1_b.reshape(1, -1), fc2_w, fc2_b.reshape(1, -1)]
    return pl.pallas_call(
        _lstm_fc_kernel,
        out_shape=jax.ShapeDtypeStruct((B, 1), jnp.float32),
        in_specs=[VMEM_SPEC] * len(args),
        out_specs=VMEM_SPEC,
        scratch_shapes=[pltpu.VMEM((S, B, LSTM_H), jnp.float32)],
    )(*args)


# ----------------------------- parameters (deterministic init) -----------------------------

def init_params(key):
    keys = jax.random.split(key, 64)
    ki = iter(keys)

    def dense(shape, scale=0.02):
        return scale * jax.random.normal(next(ki), shape, dtype=jnp.float32)

    params = {
        "word_emb": dense((VOCAB, H)),
        "pos_emb": dense((MAX_POS, H)),
        "emb_ln_g": jnp.ones((H,), jnp.float32),
        "emb_ln_b": jnp.zeros((H,), jnp.float32),
        "bert_layers": [],
        "lstm_layers": [],
    }
    for _ in range(N_BERT_LAYERS):
        params["bert_layers"].append({
            "wqkv": dense((H, 3 * H)), "bqkv": jnp.zeros((3 * H,), jnp.float32),
            "wo": dense((H, H)), "bo": jnp.zeros((H,), jnp.float32),
            "ln1_g": jnp.ones((H,), jnp.float32), "ln1_b": jnp.zeros((H,), jnp.float32),
            "w1": dense((H, FFN)), "b1": jnp.zeros((FFN,), jnp.float32),
            "w2": dense((FFN, H)), "b2": jnp.zeros((H,), jnp.float32),
            "ln2_g": jnp.ones((H,), jnp.float32), "ln2_b": jnp.zeros((H,), jnp.float32),
        })
    in_size = H + NUM_FEAT
    for _ in range(NUM_LSTM_LAYERS):
        params["lstm_layers"].append({
            # per-gate pre-split weights (i, f, g, o) to avoid lane-offset gate slicing
            "w_ih": dense((4, in_size, LSTM_H), 0.1),
            "w_hh": dense((4, LSTM_H, LSTM_H), 0.1),
            "b": jnp.zeros((4, 1, LSTM_H), jnp.float32),   # b_ih + b_hh folded together
        })
        in_size = LSTM_H
    params["fc1_w"] = dense((LSTM_H, 64))
    params["fc1_b"] = jnp.zeros((64,), jnp.float32)
    params["fc2_w"] = dense((64, 1))
    params["fc2_b"] = jnp.zeros((1,), jnp.float32)
    return params


# ----------------------------- forward pass -----------------------------

def bert_lstm_forward(params, input_ids, attention_mask, numerical_features):
    B, S = input_ids.shape
    p = params

    # --- BERT embeddings: gather in plain JAX glue, add+LN fused in one kernel ---
    word = jnp.take(p["word_emb"], input_ids, axis=0)               # (B,S,H)
    pos = p["pos_emb"][:S][None, :, :]                               # (1,S,H)
    h = embed_layernorm(word, pos, p["emb_ln_g"], p["emb_ln_b"])     # (B,S,H)

    # additive attention mask shared by all heads/layers: (B,1,S)
    bias = ((1.0 - attention_mask.astype(jnp.float32)) * -1e9)[:, None, :]

    # --- BERT transformer encoder: one fused Pallas kernel per layer ---
    for lp in p["bert_layers"]:
        h = bert_layer(h, bias, lp)

    bert_output = h                      # (B,S,H); bert_dropout = identity (eval mode)

    # TODO(synk): the reference module declares LSTM input_size = hidden + 4 yet
    # concatenates a single unsqueezed feature (shape bug in the original code);
    # we honour the declared input_size and concat 4 numerical features per step.
    combined = jnp.concatenate([bert_output, numerical_features], axis=-1)  # (B,S,H+4)
    x_tm = combined.transpose(1, 0, 2)   # time-major (S,B,H+4), tiny JAX glue

    # --- stacked 3-layer LSTM + fc1/relu + fc2, all in one fused kernel ---
    return lstm_fc_head(x_tm, p["lstm_layers"],
                        p["fc1_w"], p["fc1_b"], p["fc2_w"], p["fc2_b"])


# ----------------------------- main -----------------------------

if __name__ == "__main__":
    key = jax.random.PRNGKey(0)
    k_ids, k_feat, k_params = jax.random.split(key, 3)

    B, S = 2, 8
    input_ids = jax.random.randint(k_ids, (B, S), 0, VOCAB, dtype=jnp.int32)
    attention_mask = jnp.ones((B, S), dtype=jnp.int32).at[1, 6:].set(0)
    numerical_features = jax.random.normal(k_feat, (B, S, NUM_FEAT), dtype=jnp.float32)

    params = init_params(k_params)

    out = bert_lstm_forward(params, input_ids, attention_mask, numerical_features)
    out = jax.block_until_ready(out)
    assert out.shape == (B, 1), out.shape
    assert jnp.all(jnp.isfinite(out))
    print("KERNEL_OK")
</pallas_src>

<mosaic_0001>
module attributes {stable_mosaic.version = 11 : i64} {
  func.func @_embed_ln_kernel(%arg0: memref<2x8x32xf32, #tpu.memory_space<vmem>>, %arg1: memref<1x8x32xf32, #tpu.memory_space<vmem>>, %arg2: memref<1x1x32xf32, #tpu.memory_space<vmem>>, %arg3: memref<1x1x32xf32, #tpu.memory_space<vmem>>, %arg4: memref<2x8x32xf32, #tpu.memory_space<vmem>>) attributes {dimension_semantics = [], scalar_prefetch = 0 : i64, scratch_operands = 0 : i64, tpu.core_type = #tpu.core_type<tc>} {
    %c0 = arith.constant 0 : index
    %c0_0 = arith.constant 0 : index
    %c0_1 = arith.constant 0 : index
    %0 = vector.load %arg0[%c0, %c0_0, %c0_1] : memref<2x8x32xf32, #tpu.memory_space<vmem>>, vector<2x8x32xf32>
    %c0_2 = arith.constant 0 : index
    %c0_3 = arith.constant 0 : index
    %c0_4 = arith.constant 0 : index
    %1 = vector.load %arg1[%c0_2, %c0_3, %c0_4] : memref<1x8x32xf32, #tpu.memory_space<vmem>>, vector<1x8x32xf32>
    %2 = vector.broadcast %1 : vector<1x8x32xf32> to vector<2x8x32xf32>
    %3 = arith.addf %0, %2 : vector<2x8x32xf32>
    %c0_5 = arith.constant 0 : index
    %c0_6 = arith.constant 0 : index
    %c0_7 = arith.constant 0 : index
    %4 = vector.load %arg2[%c0_5, %c0_6, %c0_7] : memref<1x1x32xf32, #tpu.memory_space<vmem>>, vector<1x1x32xf32>
    %c0_8 = arith.constant 0 : index
    %c0_9 = arith.constant 0 : index
    %c0_10 = arith.constant 0 : index
    %5 = vector.load %arg3[%c0_8, %c0_9, %c0_10] : memref<1x1x32xf32, #tpu.memory_space<vmem>>, vector<1x1x32xf32>
    %cst = arith.constant dense<0.000000e+00> : vector<2x8xf32>
    %6 = vector.multi_reduction <add>, %3, %cst [2] : vector<2x8x32xf32> to vector<2x8xf32>
    %7 = vector.shape_cast %6 : vector<2x8xf32> to vector<2x8x1xf32>
    %cst_11 = arith.constant 3.200000e+01 : f32
    %8 = vector.broadcast %cst_11 : f32 to vector<2x8x1xf32>
    %9 = arith.divf %7, %8 : vector<2x8x1xf32>
    %10 = vector.broadcast %9 : vector<2x8x1xf32> to vector<2x8x32xf32>
    %11 = arith.subf %3, %10 : vector<2x8x32xf32>
    %12 = arith.mulf %11, %11 : vector<2x8x32xf32>
    %cst_12 = arith.constant dense<0.000000e+00> : vector<2x8xf32>
    %13 = vector.multi_reduction <add>, %12, %cst_12 [2] : vector<2x8x32xf32> to vector<2x8xf32>
    %14 = vector.shape_cast %13 : vector<2x8xf32> to vector<2x8x1xf32>
    %cst_13 = arith.constant 3.200000e+01 : f32
    %15 = vector.broadcast %cst_13 : f32 to vector<2x8x1xf32>
    %16 = arith.divf %14, %15 : vector<2x8x1xf32>
    %17 = vector.broadcast %9 : vector<2x8x1xf32> to vector<2x8x32xf32>
    %18 = arith.subf %3, %17 : vector<2x8x32xf32>
    %cst_14 = arith.constant 9.99999996E-13 : f32
    %19 = vector.broadcast %cst_14 : f32 to vector<2x8x1xf32>
    %20 = arith.addf %16, %19 : vector<2x8x1xf32>
    %21 = math.rsqrt %20 : vector<2x8x1xf32>
    %22 = vector.broadcast %21 : vector<2x8x1xf32> to vector<2x8x32xf32>
    %23 = arith.mulf %18, %22 : vector<2x8x32xf32>
    %24 = vector.broadcast %4 : vector<1x1x32xf32> to vector<2x8x32xf32>
    %25 = arith.mulf %23, %24 : vector<2x8x32xf32>
    %26 = vector.broadcast %5 : vector<1x1x32xf32> to vector<2x8x32xf32>
    %27 = arith.addf %25, %26 : vector<2x8x32xf32>
    %c0_15 = arith.constant 0 : index
    %c0_16 = arith.constant 0 : index
    %c0_17 = arith.constant 0 : index
    %28 = vector.load %arg4[%c0_15, %c0_16, %c0_17] : memref<2x8x32xf32, #tpu.memory_space<vmem>>, vector<2x8x32xf32>
    tpu.vector_store %arg4[%c0_15, %c0_16, %c0_17], %27 {strides = array<i32>} : memref<2x8x32xf32, #tpu.memory_space<vmem>>, vector<2x8x32xf32>,
    return
  }
}

</mosaic_0001>

<bundles_post_ra>
// kernel: tpu_custom_call.1
= control target key start
LH: loop header
LB: loop body
LE: loop exit
PB: predicated region body
PF: predicated region fallthrough
CT: control target
= control target key end

     0   :  { %9 = vsyncpa [#allocation3], 0  ;;  %s249_s0 = inlined_call_operand.hbm [shape: f32[2,8,32], index: 0, kind: input, shape index: {}]   ;;  %s250_s1 = inlined_call_operand.hbm [shape: f32[1,8,32], index: 1, kind: input, shape index: {}]   ;;  %s251_s2 = inlined_call_operand.vmem [shape: f32[1,1,32], index: 2, kind: input, shape index: {}]   ;;  %s252_s3 = inlined_call_operand.vmem [shape: f32[1,1,32], index: 3, kind: input, shape index: {}]   ;;  %s253_s4 = inlined_call_operand.hbm [shape: f32[2,8,32], index: 4, kind: output, shape index: {}]  }
   0x1   :  { %10 = vsyncpa [#allocation6], 0 }
   0x2   :  { %11 = vsyncpa [#allocation4], 0  ;;  %s192_s15 = smov [#allocation2]  }
   0x3   :  { %s17_s16 = sshll.u32 %s192_s15, 4  ;;  %s18_s16 = int_to_ptr.vmem [resolvable:$true] %s17_s16 }
   0x4   :  { %s134_s17 = scalar_lea.vmem %s18_s16, 256  ;;  %p139_p1 = scmp.lt.s32.totalorder %s18_s16, %s18_s16 }
   0x5   :  { %p135_p0 = scmp.ne.s32.totalorder %s18_s16, %s134_s17  ;;  %p140_p2 = scmp.lt.s32.totalorder %s134_s17, %s134_s17 }
   0x7   :  { %p141_p3 = por %p140_p2, %p139_p1 }
   0x9   :  { %p142_p4 = pnand %p141_p3, %p135_p0 }
   0xb   :  { %145 = shalt.err (!%p142_p4)
}
   0xc   :  { %s193_s18 = smov 128   ;;  %s194_s19 = smov 8  }
   0xd   :  { %23 = dma.hbm_to_vmem [thread:$0]  %s249_s0, 256, %s18_s16, [#allocation3], %s193_s18, %s193_s18, %s194_s19  }
   0xe   :  { %s195_s22 = smov [#allocation5]  }
   0xf   :  { %s30_s23 = sshll.u32 %s195_s22, 4  ;;  %s31_s23 = int_to_ptr.vmem [resolvable:$true] %s30_s23 }
  0x10   :  { %s154_s24 = scalar_lea.vmem %s31_s23, 128  ;;  %p159_p6 = scmp.lt.s32.totalorder %s31_s23, %s31_s23 }
  0x11   :  { %p155_p5 = scmp.ne.s32.totalorder %s31_s23, %s154_s24  ;;  %p160_p7 = scmp.lt.s32.totalorder %s154_s24, %s154_s24 }
  0x13   :  { %p161_p8 = por %p160_p7, %p159_p6 }
  0x15   :  { %p162_p9 = pnand %p161_p8, %p155_p5 }
  0x17   :  { %165 = shalt.err (!%p162_p9)
}
  0x18   :  { %33 = dma.hbm_to_vmem [thread:$0]  %s250_s1, 128, %s31_s23, [#allocation6]  }
  0x19   :  { %186 = dma.done.wait [#allocation3], 256  }
  0x1a   :  { %187 = vsyncadd [#allocation3], 4294967040 }
  0x1b   :  { %188 = dma.done.wait [#allocation6], 128  }
  0x1c   :  { %189 = vsyncadd [#allocation6], 4294967168  ;;  %v44_v0 = vld [vmem:[#allocation2] sm:$0xff]  ;;  %v46_v1 = vld [vmem:[#allocation5] sm:$0xff]  ;;  %vm51_vm0 = vcmask 261120   ;;  %s196_s29 = smov [#allocation7]  }
  0x1d   :  { %v45_v2 = vld [vmem:[#allocation2 + $0x8] sm:$0xff]  ;;  %v47_v3 = vadd.f32 %v46_v1, %v44_v0  ;;  %v115_v24 = vld [vmem:[%s251_s2] ss:$0 sm:$0xff]  ;;  %s102_s30 = sshll.u32 %s196_s29, 4  ;;  %s103_s30 = int_to_ptr.vmem [resolvable:$true] %s102_s30 }
  0x1e   :  { %v48_v4 = vadd.f32 %v46_v1, %v45_v2  ;;  %v116_v26 = vld [vmem:[%s252_s3] ss:$0 sm:$0xff]  ;;  %s166_s5 = scalar_lea.vmem %s103_s30, 256  ;;  %p171_p11 = scmp.lt.s32.totalorder %s103_s30, %s103_s30 }
  0x1f   :  { %v52_v5 = vsel %vm51_vm0, %v47_v3, 0.0  ;;  %p167_p10 = scmp.ne.s32.totalorder %s103_s30, %s166_s5  ;;  %p172_p12 = scmp.lt.s32.totalorder %s166_s5, %s166_s5 }
  0x20   :  { %53 = vadd.xlane.f32.xlu0 %v52_v5  ;;  %v55_v6 = vsel %vm51_vm0, %v48_v4, 0.0 }
  0x21   :  { %p173_p13 = por %p172_p12, %p171_p11 }
  0x23   :  { %p174_p0 = pnand %p173_p13, %p167_p10 }
  0x24   :  { %56 = vadd.xlane.f32.xlu0 %v55_v6 }
  0xa9   :  { %v54_v7 = vpop.xlane.xlu0 %53 }
  0xaa   :  { %v59_v8 = vmul.f32 0.03125, %v54_v7 }
  0xac   :  { %v61_v9 = vsub.f32 %v47_v3, %v59_v8 }
  0xad   :  { %v57_v10 = vpop.xlane.xlu0 %56 }
  0xae   :  { %v60_v11 = vmul.f32 0.03125, %v57_v10  ;;  %v63_v12 = vmul.f32 %v61_v9, %v61_v9 }
  0xb0   :  { %v62_v13 = vsub.f32 %v48_v4, %v60_v11  ;;  %v65_v14 = vsel %vm51_vm0, %v63_v12, 0.0 }
  0xb1   :  { %66 = vadd.xlane.f32.xlu1 %v65_v14 }
  0xb2   :  { %v64_v15 = vmul.f32 %v62_v13, %v62_v13 }
  0xb4   :  { %v68_v16 = vsel %vm51_vm0, %v64_v15, 0.0 }
  0xb5   :  { %69 = vadd.xlane.f32.xlu1 %v68_v16 }
 0x13a   :  { %v67_v17 = vpop.xlane.xlu1 %66 }
 0x13b   :  { %v71_v18 = vmul.f32 0.03125, %v67_v17 }
 0x13d   :  { %v73_v19 = vadd.f32 1e-12, %v71_v18 }
 0x13e   :  { %v70_v20 = vpop.xlane.xlu1 %69 }
 0x13f   :  { %122 = vrsqrt.f32 %v73_v19  ;;  %v72_v21 = vmul.f32 0.03125, %v70_v20 }
 0x141   :  { %v74_v22 = vadd.f32 1e-12, %v72_v21 }
 0x143   :  { %124 = vrsqrt.f32 %v74_v22 }
 0x14c   :  { %v123_v23 = vpop.eup %122 }
 0x14d   :  { %v77_v25 = vmul.f32 %v123_v23, %v61_v9 }
 0x14f   :  { %v85_v27 = vmul.f32 %v115_v24, %v77_v25 }
 0x150   :  { %v125_v28 = vpop.eup %124 }
 0x151   :  { %v78_v29 = vmul.f32 %v125_v28, %v62_v13  ;;  %v93_v30 = vadd.f32 %v116_v26, %v85_v27 }
 0x153   :  { %v86_v31 = vmul.f32 %v115_v24, %v78_v29  ;;  %95 = vst.msk [vmem:[#allocation7] sm:$0xff] %vm51_vm0, %v93_v30 }
 0x155   :  { %v94_v32 = vadd.f32 %v116_v26, %v86_v31 }
 0x157   :  { %96 = vst.msk [vmem:[#allocation7 + $0x8] sm:$0xff] %vm51_vm0, %v94_v32 }
 0x158   :  { %177 = shalt.err (!%p174_p0)
}
 0x159   :  { %108 = dma.vmem_to_hbm [thread:$0]  %s103_s30, 256, %s253_s4, [#allocation4], %s193_s18, %s193_s18, %s194_s19  }
 0x15a   :  { %190 = dma.done.wait [#allocation4], 256  }
 0x15b   :  { %191 = vsyncadd [#allocation4], 4294967040 }
 0x15c   :  { %112 = vsyncpa [#allocation3], 1 }
 0x15d   :  { %113 = vsyncpa [#allocation6], 1 }
 0x15e   :  { %114 = vsyncpa [#allocation4], 1 }

</bundles_post_ra>
